<compile_context>
chip_gen: v5e
topology: v5e:2x2
jax: 0.10.0
libtpu: 0.0.40
codegen_flags: <defaults>
</compile_context>

<pallas_src>
import jax
import jax.numpy as jnp
import numpy as np
from jax.experimental import pallas as pl
from jax.experimental.pallas import tpu as pltpu

EPS = 1e-5
K = 4          # all decoder kernels are 4x4
LANES = 128


# ------------------------------- helpers ------------------------------------

def _round_up(x, m):
    return (x + m - 1) // m * m


def _pick_row_tile(rows, target=512):
    """Largest row tile <= target that divides `rows` (multiple of 8), or full."""
    if rows <= target:
        return rows
    t = (target // 8) * 8
    while t >= 8:
        if rows % t == 0:
            return t
        t -= 8
    return rows


# ----------------------------- Pallas kernels -------------------------------

def _matmul_stats_kernel(p_ref, w_ref, y_ref, stats_ref):
    # p: (TR, KD) bf16, w: (KD, OCp) bf16  ->  y: (TR, OCp) f32
    # stats: (2, OCp) f32 partials -- row 0 = sum(y), row 1 = sum(y*y)
    y = jnp.dot(p_ref[...], w_ref[...], preferred_element_type=jnp.float32)
    y_ref[...] = y
    stats_ref[0:1, :] = jnp.sum(y, axis=0, keepdims=True)
    stats_ref[1:2, :] = jnp.sum(y * y, axis=0, keepdims=True)


def _matmul_tanh_kernel(p_ref, w_ref, o_ref):
    y = jnp.dot(p_ref[...], w_ref[...], preferred_element_type=jnp.float32)
    o_ref[...] = jnp.tanh(y)


def _scale_bias_relu_kernel(y_ref, s_ref, b_ref, o_ref):
    # y: (TR, OCp) f32, s/b: (1, OCp) f32 -> bf16 out (single FMA + ReLU)
    o_ref[...] = jnp.maximum(y_ref[...] * s_ref[...] + b_ref[...],
                             0.0).astype(jnp.bfloat16)


# ----------------------------- kernel wrappers -------------------------------

def phase_matmul_stats(patches, weights):
    """patches: (Pp, R, KD) bf16 (Pp == P or 1), weights: (P, KD, OCp) bf16.

    Returns y: (P, R, OCp) f32 and per-(phase, row-tile) BN partial stats
    (P, NR, 2, OCp) f32."""
    P, KD, OCp = weights.shape
    R = patches.shape[1]
    assert patches.shape[2] == KD
    TR = _pick_row_tile(R)
    NR = R // TR

    if patches.shape[0] == P:
        p_map = lambda p, r: (p, r, 0)
    else:                                # broadcast patches across phases
        p_map = lambda p, r: (0, r, 0)

    return pl.pallas_call(
        _matmul_stats_kernel,
        grid=(P, NR),
        in_specs=[
            pl.BlockSpec((None, TR, KD), p_map),
            pl.BlockSpec((None, KD, OCp), lambda p, r: (p, 0, 0)),
        ],
        out_specs=(
            pl.BlockSpec((None, TR, OCp), lambda p, r: (p, r, 0)),
            pl.BlockSpec((None, None, 2, OCp), lambda p, r: (p, r, 0, 0)),
        ),
        out_shape=(
            jax.ShapeDtypeStruct((P, R, OCp), jnp.float32),
            jax.ShapeDtypeStruct((P, NR, 2, OCp), jnp.float32),
        ),
        compiler_params=pltpu.CompilerParams(
            dimension_semantics=("parallel", "parallel")),
    )(patches, weights)


def phase_matmul_tanh(patches, weights):
    """patches: (P, R, KD) bf16, weights: (P, KD, OCp) bf16 -> tanh(P@W) f32."""
    P, KD, OCp = weights.shape
    R = patches.shape[1]
    TR = _pick_row_tile(R)
    NR = R // TR
    return pl.pallas_call(
        _matmul_tanh_kernel,
        grid=(P, NR),
        in_specs=[
            pl.BlockSpec((None, TR, KD), lambda p, r: (p, r, 0)),
            pl.BlockSpec((None, KD, OCp), lambda p, r: (p, 0, 0)),
        ],
        out_specs=pl.BlockSpec((None, TR, OCp), lambda p, r: (p, r, 0)),
        out_shape=jax.ShapeDtypeStruct((P, R, OCp), jnp.float32),
        compiler_params=pltpu.CompilerParams(
            dimension_semantics=("parallel", "parallel")),
    )(patches, weights)


def scale_bias_relu(y, scale, bias):
    """y: (Rtot, OCp) f32, scale/bias: (1, OCp) f32 -> bf16 (Rtot, OCp)."""
    Rtot, OCp = y.shape
    TR = _pick_row_tile(Rtot, target=1024)
    NR = Rtot // TR
    return pl.pallas_call(
        _scale_bias_relu_kernel,
        grid=(NR,),
        in_specs=[
            pl.BlockSpec((TR, OCp), lambda r: (r, 0)),
            pl.BlockSpec((1, OCp), lambda r: (0, 0)),
            pl.BlockSpec((1, OCp), lambda r: (0, 0)),
        ],
        out_specs=pl.BlockSpec((TR, OCp), lambda r: (r, 0)),
        out_shape=jax.ShapeDtypeStruct((Rtot, OCp), jnp.bfloat16),
        compiler_params=pltpu.CompilerParams(dimension_semantics=("parallel",)),
    )(y, scale, bias)


# -------------------- weight / patch preparation (XLA glue) ------------------

def first_layer_weights(w, ocp):
    # w: (IC, OC, 4, 4). Stride-1, pad-0, 1x1 input: out[oy,ox] uses w[:,:,oy,ox].
    ic, oc = w.shape[0], w.shape[1]
    wt = jnp.transpose(w, (2, 3, 0, 1)).reshape(16, ic, oc)   # phase p = oy*4+ox
    wp = jnp.zeros((16, ic, ocp), w.dtype).at[:, :, :oc].set(wt)
    return wp.astype(jnp.bfloat16)


def up_layer_weights(w, ocp):
    # w: (IC, OC, 4, 4) -> (4, 4*IC, OCp).  Phase p = py*2+px, taps ordered
    # (dy, dx, ic);  ky = 3 - 2*dy - py, kx = 3 - 2*dx - px.
    ic, oc = w.shape[0], w.shape[1]
    mats = []
    for py in range(2):
        for px in range(2):
            taps = []
            for dy in range(2):
                for dx in range(2):
                    taps.append(w[:, :, 3 - 2 * dy - py, 3 - 2 * dx - px])
            mats.append(jnp.concatenate(taps, axis=0))         # (4*IC, OC)
    wall = jnp.stack(mats, axis=0)                             # (4, 4*IC, OC)
    wp = jnp.zeros((4, 4 * ic, ocp), w.dtype).at[:, :, :oc].set(wall)
    return wp.astype(jnp.bfloat16)


def up_layer_patches(x_bf):
    # x_bf: (B, H, W, IC) bf16 -> (4, B*H*W, 4*IC): per-phase 2x2 sub-pixel taps.
    b, h, w, ic = x_bf.shape
    xp = jnp.pad(x_bf, ((0, 0), (1, 1), (1, 1), (0, 0)))
    phases = []
    for py in range(2):
        for px in range(2):
            taps = [xp[:, py + dy: py + dy + h, px + dx: px + dx + w, :]
                    for dy in range(2) for dx in range(2)]
            phases.append(jnp.concatenate(taps, axis=-1).reshape(b * h * w, 4 * ic))
    return jnp.stack(phases, axis=0)


def bn_scale_bias(stats, gamma, beta, count, ocp):
    # Fold BN into a single per-channel scale/bias (two-pass BN, pass 2 prep).
    s = jnp.sum(stats[:, :, 0, :], axis=(0, 1))
    ss = jnp.sum(stats[:, :, 1, :], axis=(0, 1))
    mean = s / count
    var = jnp.maximum(ss / count - mean * mean, 0.0)
    gp = jnp.zeros((ocp,), jnp.float32).at[:gamma.shape[0]].set(gamma)
    bp = jnp.zeros((ocp,), jnp.float32).at[:beta.shape[0]].set(beta)
    scale = gp * jax.lax.rsqrt(var + EPS)
    bias = bp - mean * scale
    return scale[None, :], bias[None, :]


# ------------------------- decoder construction ------------------------------

def decoder_layer_configs(isize, nz, nc, ngf):
    assert isize % 16 == 0
    cngf, tisize = ngf // 2, 4
    while tisize != isize:
        cngf *= 2
        tisize *= 2
    layers = [dict(cin=nz, cout=cngf, stride=1, pad=0, bn=True, act="relu")]
    csize = 4
    while csize < isize // 2:
        layers.append(dict(cin=cngf, cout=cngf // 2, stride=2, pad=1, bn=True, act="relu"))
        cngf //= 2
        csize *= 2
    layers.append(dict(cin=cngf, cout=nc, stride=2, pad=1, bn=False, act="tanh"))
    return layers


def init_params(key, layers):
    params = []
    for cfg in layers:
        key, kw, kg = jax.random.split(key, 3)
        p = {"w": 0.02 * jax.random.normal(kw, (cfg["cin"], cfg["cout"], K, K), jnp.float32)}
        if cfg["bn"]:
            p["gamma"] = 1.0 + 0.02 * jax.random.normal(kg, (cfg["cout"],), jnp.float32)
            p["beta"] = jnp.zeros((cfg["cout"],), jnp.float32)
        params.append(p)
    return params


# ------------------------------- forward -------------------------------------

def netg_forward(x_nchw, layers, params):
    B = x_nchw.shape[0]
    nz = x_nchw.shape[1]
    x = x_nchw.reshape(B, nz).astype(jnp.bfloat16)          # latent is (B, nz, 1, 1)

    # -- layer 0: ConvTranspose2d(nz, cngf, 4, 1, 0): 1x1 -> 4x4, BN + ReLU --
    cfg0, p0 = layers[0], params[0]
    oc0 = cfg0["cout"]
    ocp0 = _round_up(oc0, LANES)
    w0 = first_layer_weights(p0["w"], ocp0)                  # (16, nz, OCp)
    y0, st0 = phase_matmul_stats(x[None], w0)                # (16, B, OCp)
    scale0, bias0 = bn_scale_bias(st0, p0["gamma"], p0["beta"], 16 * B, ocp0)
    a0 = scale_bias_relu(y0.reshape(16 * B, ocp0), scale0, bias0)
    act = a0.reshape(4, 4, B, ocp0).transpose(2, 0, 1, 3)[..., :oc0]   # (B,4,4,OC)
    H = W = 4

    # -- intermediate stride-2 layers: ConvTranspose2d(c, c//2, 4, 2, 1), BN+ReLU --
    for cfg, p in zip(layers[1:-1], params[1:-1]):
        oc = cfg["cout"]
        ocp = _round_up(oc, LANES)
        wmat = up_layer_weights(p["w"], ocp)                 # (4, 4*IC, OCp)
        patches = up_layer_patches(act)                      # (4, B*H*W, 4*IC)
        y, st = phase_matmul_stats(patches, wmat)            # (4, B*H*W, OCp)
        count = 4 * B * H * W
        scale, bias = bn_scale_bias(st, p["gamma"], p["beta"], count, ocp)
        a = scale_bias_relu(y.reshape(4 * B * H * W, ocp), scale, bias)
        a = a.reshape(2, 2, B, H, W, ocp).transpose(2, 3, 0, 4, 1, 5)
        act = a.reshape(B, 2 * H, 2 * W, ocp)[..., :oc]      # interleave phases
        H, W = 2 * H, 2 * W

    # -- final stride-2 layer: ConvTranspose2d(c, nc, 4, 2, 1) + Tanh --
    cfg, p = layers[-1], params[-1]
    oc = cfg["cout"]
    ocp = _round_up(oc, LANES)
    wmat = up_layer_weights(p["w"], ocp)
    patches = up_layer_patches(act)
    y = phase_matmul_tanh(patches, wmat)                     # (4, B*H*W, OCp) f32
    y = y.reshape(2, 2, B, H, W, ocp).transpose(2, 3, 0, 4, 1, 5)
    out_nhwc = y.reshape(B, 2 * H, 2 * W, ocp)[..., :oc]
    return jnp.transpose(out_nhwc, (0, 3, 1, 2))             # NCHW like PyTorch


# --------------------------- pure-JAX reference -------------------------------

def _bf(x):
    # match the kernel's bf16 MXU inputs (exactly-representable values)
    return x.astype(jnp.bfloat16).astype(jnp.float32)


def conv_transpose_ref(x_nhwc, w_ct, stride, pad):
    wflip = jnp.transpose(w_ct, (2, 3, 0, 1))[::-1, ::-1]    # (K, K, IC, OC)
    return jax.lax.conv_general_dilated(
        _bf(x_nhwc), _bf(wflip), window_strides=(1, 1),
        padding=((K - 1 - pad,) * 2, (K - 1 - pad,) * 2),
        lhs_dilation=(stride, stride),
        dimension_numbers=("NHWC", "HWIO", "NHWC"),
        precision=jax.lax.Precision.HIGHEST)


def reference_forward(x_nchw, layers, params):
    x = jnp.transpose(x_nchw, (0, 2, 3, 1)).astype(jnp.float32)
    for cfg, p in zip(layers, params):
        x = conv_transpose_ref(x, p["w"], cfg["stride"], cfg["pad"])
        if cfg["bn"]:
            mean = x.mean(axis=(0, 1, 2), keepdims=True)
            var = jnp.square(x - mean).mean(axis=(0, 1, 2), keepdims=True)
            x = jnp.maximum((x - mean) * jax.lax.rsqrt(var + EPS) * p["gamma"] + p["beta"], 0.0)
        else:
            x = jnp.tanh(x)
    return jnp.transpose(x, (0, 3, 1, 2))


# ---------------------------------- main --------------------------------------

if __name__ == "__main__":
    B, isize, nz, nc, ngf = 2, 16, 64, 3, 16
    layers = decoder_layer_configs(isize, nz, nc, ngf)

    key = jax.random.PRNGKey(0)
    kx, kp = jax.random.split(key)
    params = init_params(kp, layers)
    x = jax.random.normal(kx, (B, nz, 1, 1), jnp.float32)    # NCHW latent, like PyTorch

    fwd = jax.jit(lambda xx, pp: netg_forward(xx, layers, pp))
    out = jax.block_until_ready(fwd(x, params))
    assert out.shape == (B, nc, isize, isize), out.shape

    ref = jax.block_until_ready(reference_forward(x, layers=layers, params=params))
    np.testing.assert_allclose(np.asarray(out), np.asarray(ref), rtol=2e-3, atol=2e-3)

    print("KERNEL_OK")
</pallas_src>

<mosaic_0001>
module attributes {stable_mosaic.version = 11 : i64} {
  func.func @_matmul_stats_kernel(%arg0: i32, %arg1: i32, %arg2: memref<1x2x64xbf16, #tpu.memory_space<vmem>>, %arg3: memref<1x64x128xbf16, #tpu.memory_space<vmem>>, %arg4: memref<1x2x128xf32, #tpu.memory_space<vmem>>, %arg5: memref<1x1x2x128xf32, #tpu.memory_space<vmem>>) attributes {dimension_semantics = [#tpu.dimension_semantics<parallel>, #tpu.dimension_semantics<parallel>], iteration_bounds = array<i64: 16, 1>, scalar_prefetch = 0 : i64, scratch_operands = 0 : i64, tpu.core_type = #tpu.core_type<tc>, window_params = [{transform_indices = @transform_0, window_bounds = array<i64: 1, 2, 64>}, {transform_indices = @transform_1, window_bounds = array<i64: 1, 64, 128>}, {transform_indices = @transform_2, window_bounds = array<i64: 1, 2, 128>}, {transform_indices = @transform_3, window_bounds = array<i64: 1, 1, 2, 128>}]} {
    %c0 = arith.constant 0 : index
    %c0_0 = arith.constant 0 : index
    %c0_1 = arith.constant 0 : index
    %0 = vector.load %arg2[%c0, %c0_0, %c0_1] : memref<1x2x64xbf16, #tpu.memory_space<vmem>>, vector<1x2x64xbf16>
    %1 = vector.shape_cast %0 : vector<1x2x64xbf16> to vector<2x64xbf16>
    %c0_2 = arith.constant 0 : index
    %c0_3 = arith.constant 0 : index
    %c0_4 = arith.constant 0 : index
    %2 = vector.load %arg3[%c0_2, %c0_3, %c0_4] : memref<1x64x128xbf16, #tpu.memory_space<vmem>>, vector<1x64x128xbf16>
    %3 = vector.shape_cast %2 : vector<1x64x128xbf16> to vector<64x128xbf16>
    %cst = arith.constant dense<0.000000e+00> : vector<2x128xf32>
    %4 = tpu.matmul %1, %3, %cst {dimension_numbers = #tpu.dot_dimension_numbers<[1], [0], [0], [1], [0, 0, 1, 1], [], []>} : vector<2x64xbf16>, vector<64x128xbf16>, vector<2x128xf32> -> vector<2x128xf32>
    %c0_5 = arith.constant 0 : index
    %c0_6 = arith.constant 0 : index
    %c0_7 = arith.constant 0 : index
    %5 = vector.load %arg4[%c0_5, %c0_6, %c0_7] : memref<1x2x128xf32, #tpu.memory_space<vmem>>, vector<1x2x128xf32>
    %6 = vector.shape_cast %5 : vector<1x2x128xf32> to vector<2x128xf32>
    %7 = vector.shape_cast %4 : vector<2x128xf32> to vector<1x2x128xf32>
    tpu.vector_store %arg4[%c0_5, %c0_6, %c0_7], %7 {strides = array<i32>} : memref<1x2x128xf32, #tpu.memory_space<vmem>>, vector<1x2x128xf32>,
    %cst_8 = arith.constant dense<0.000000e+00> : vector<128xf32>
    %8 = vector.multi_reduction <add>, %4, %cst_8 [0] : vector<2x128xf32> to vector<128xf32>
    %9 = vector.shape_cast %8 : vector<128xf32> to vector<1x128xf32>
    %c0_9 = arith.constant 0 : index
    %c0_10 = arith.constant 0 : index
    %c0_11 = arith.constant 0 : index
    %c0_12 = arith.constant 0 : index
    %10 = vector.load %arg5[%c0_9, %c0_10, %c0_11, %c0_12] : memref<1x1x2x128xf32, #tpu.memory_space<vmem>>, vector<1x1x1x128xf32>
    %11 = vector.shape_cast %10 : vector<1x1x1x128xf32> to vector<1x128xf32>
    %12 = vector.shape_cast %9 : vector<1x128xf32> to vector<1x1x1x128xf32>
    tpu.vector_store %arg5[%c0_9, %c0_10, %c0_11, %c0_12], %12 {strides = array<i32>} : memref<1x1x2x128xf32, #tpu.memory_space<vmem>>, vector<1x1x1x128xf32>,
    %13 = arith.mulf %4, %4 : vector<2x128xf32>
    %cst_13 = arith.constant dense<0.000000e+00> : vector<128xf32>
    %14 = vector.multi_reduction <add>, %13, %cst_13 [0] : vector<2x128xf32> to vector<128xf32>
    %15 = vector.shape_cast %14 : vector<128xf32> to vector<1x128xf32>
    %c0_14 = arith.constant 0 : index
    %c0_15 = arith.constant 0 : index
    %c1 = arith.constant 1 : index
    %c0_16 = arith.constant 0 : index
    %16 = vector.load %arg5[%c0_14, %c0_15, %c1, %c0_16] : memref<1x1x2x128xf32, #tpu.memory_space<vmem>>, vector<1x1x1x128xf32>
    %17 = vector.shape_cast %16 : vector<1x1x1x128xf32> to vector<1x128xf32>
    %18 = vector.shape_cast %15 : vector<1x128xf32> to vector<1x1x1x128xf32>
    tpu.vector_store %arg5[%c0_14, %c0_15, %c1, %c0_16], %18 {strides = array<i32>} : memref<1x1x2x128xf32, #tpu.memory_space<vmem>>, vector<1x1x1x128xf32>,
    return
  }
  func.func @transform_0(%arg0: i32, %arg1: i32) -> (i32, i32, i32) {
    %c0_i32 = arith.constant 0 : i32
    %c0_i32_0 = arith.constant 0 : i32
    %c0_i32_1 = arith.constant 0 : i32
    return %c0_i32, %arg1, %c0_i32_0 : i32, i32, i32
  }
  func.func @transform_1(%arg0: i32, %arg1: i32) -> (i32, i32, i32) {
    %c0_i32 = arith.constant 0 : i32
    %c0_i32_0 = arith.constant 0 : i32
    %c0_i32_1 = arith.constant 0 : i32
    return %arg0, %c0_i32, %c0_i32_0 : i32, i32, i32
  }
  func.func @transform_2(%arg0: i32, %arg1: i32) -> (i32, i32, i32) {
    %c0_i32 = arith.constant 0 : i32
    %c0_i32_0 = arith.constant 0 : i32
    return %arg0, %arg1, %c0_i32 : i32, i32, i32
  }
  func.func @transform_3(%arg0: i32, %arg1: i32) -> (i32, i32, i32, i32) {
    %c0_i32 = arith.constant 0 : i32
    %c0_i32_0 = arith.constant 0 : i32
    %c0_i32_1 = arith.constant 0 : i32
    return %arg0, %arg1, %c0_i32, %c0_i32_0 : i32, i32, i32, i32
  }
}

module attributes {stable_mosaic.version = 11 : i64} {
  func.func @_scale_bias_relu_kernel(%arg0: i32, %arg1: memref<32x128xf32, #tpu.memory_space<vmem>>, %arg2: memref<1x128xf32, #tpu.memory_space<vmem>>, %arg3: memref<1x128xf32, #tpu.memory_space<vmem>>, %arg4: memref<32x128xbf16, #tpu.memory_space<vmem>>) attributes {dimension_semantics = [#tpu.dimension_semantics<parallel>], iteration_bounds = array<i64: 1>, scalar_prefetch = 0 : i64, scratch_operands = 0 : i64, tpu.core_type = #tpu.core_type<tc>, window_params = [{transform_indices = @transform_0, window_bounds = array<i64: 32, 128>}, {pipeline_mode = #tpu.pipeline_mode<synchronous>, transform_indices = @transform_1, window_bounds = array<i64: 1, 128>}, {pipeline_mode = #tpu.pipeline_mode<synchronous>, transform_indices = @transform_2, window_bounds = array<i64: 1, 128>}, {transform_indices = @transform_3, window_bounds = array<i64: 32, 128>}]} {
    %c0 = arith.constant 0 : index
    %c0_0 = arith.constant 0 : index
    %0 = vector.load %arg1[%c0, %c0_0] : memref<32x128xf32, #tpu.memory_space<vmem>>, vector<32x128xf32>
    %c0_1 = arith.constant 0 : index
    %c0_2 = arith.constant 0 : index
    %1 = vector.load %arg2[%c0_1, %c0_2] : memref<1x128xf32, #tpu.memory_space<vmem>>, vector<1x128xf32>
    %2 = vector.broadcast %1 : vector<1x128xf32> to vector<32x128xf32>
    %3 = arith.mulf %0, %2 : vector<32x128xf32>
    %c0_3 = arith.constant 0 : index
    %c0_4 = arith.constant 0 : index
    %4 = vector.load %arg3[%c0_3, %c0_4] : memref<1x128xf32, #tpu.memory_space<vmem>>, vector<1x128xf32>
    %5 = vector.broadcast %4 : vector<1x128xf32> to vector<32x128xf32>
    %6 = arith.addf %3, %5 : vector<32x128xf32>
    %cst = arith.constant 0.000000e+00 : f32
    %7 = vector.broadcast %cst : f32 to vector<32x128xf32>
    %8 = arith.maximumf %6, %7 : vector<32x128xf32>
    %9 = arith.truncf %8 : vector<32x128xf32> to vector<32x128xbf16>
    %c0_5 = arith.constant 0 : index
    %c0_6 = arith.constant 0 : index
    %10 = vector.load %arg4[%c0_5, %c0_6] : memref<32x128xbf16, #tpu.memory_space<vmem>>, vector<32x128xbf16>
    tpu.vector_store %arg4[%c0_5, %c0_6], %9 {strides = array<i32>} : memref<32x128xbf16, #tpu.memory_space<vmem>>, vector<32x128xbf16>,
    return
  }
  func.func @transform_0(%arg0: i32) -> (i32, i32) {
    %c0_i32 = arith.constant 0 : i32
    %c0_i32_0 = arith.constant 0 : i32
    return %arg0, %c0_i32 : i32, i32
  }
  func.func @transform_1(%arg0: i32) -> (i32, i32) {
    %c0_i32 = arith.constant 0 : i32
    %c0_i32_0 = arith.constant 0 : i32
    %c0_i32_1 = arith.constant 0 : i32
    return %c0_i32, %c0_i32_0 : i32, i32
  }
  func.func @transform_2(%arg0: i32) -> (i32, i32) {
    %c0_i32 = arith.constant 0 : i32
    %c0_i32_0 = arith.constant 0 : i32
    %c0_i32_1 = arith.constant 0 : i32
    return %c0_i32, %c0_i32_0 : i32, i32
  }
  func.func @transform_3(%arg0: i32) -> (i32, i32) {
    %c0_i32 = arith.constant 0 : i32
    %c0_i32_0 = arith.constant 0 : i32
    return %arg0, %c0_i32 : i32, i32
  }
}

module attributes {stable_mosaic.version = 11 : i64} {
  func.func @_scale_bias_relu_kernel(%arg0: i32, %arg1: memref<128x128xf32, #tpu.memory_space<vmem>>, %arg2: memref<1x128xf32, #tpu.memory_space<vmem>>, %arg3: memref<1x128xf32, #tpu.memory_space<vmem>>, %arg4: memref<128x128xbf16, #tpu.memory_space<vmem>>) attributes {dimension_semantics = [#tpu.dimension_semantics<parallel>], iteration_bounds = array<i64: 1>, scalar_prefetch = 0 : i64, scratch_operands = 0 : i64, tpu.core_type = #tpu.core_type<tc>, window_params = [{transform_indices = @transform_0, window_bounds = array<i64: 128, 128>}, {pipeline_mode = #tpu.pipeline_mode<synchronous>, transform_indices = @transform_1, window_bounds = array<i64: 1, 128>}, {pipeline_mode = #tpu.pipeline_mode<synchronous>, transform_indices = @transform_2, window_bounds = array<i64: 1, 128>}, {transform_indices = @transform_3, window_bounds = array<i64: 128, 128>}]} {
    %c0 = arith.constant 0 : index
    %c0_0 = arith.constant 0 : index
    %0 = vector.load %arg1[%c0, %c0_0] : memref<128x128xf32, #tpu.memory_space<vmem>>, vector<128x128xf32>
    %c0_1 = arith.constant 0 : index
    %c0_2 = arith.constant 0 : index
    %1 = vector.load %arg2[%c0_1, %c0_2] : memref<1x128xf32, #tpu.memory_space<vmem>>, vector<1x128xf32>
    %2 = vector.broadcast %1 : vector<1x128xf32> to vector<128x128xf32>
    %3 = arith.mulf %0, %2 : vector<128x128xf32>
    %c0_3 = arith.constant 0 : index
    %c0_4 = arith.constant 0 : index
    %4 = vector.load %arg3[%c0_3, %c0_4] : memref<1x128xf32, #tpu.memory_space<vmem>>, vector<1x128xf32>
    %5 = vector.broadcast %4 : vector<1x128xf32> to vector<128x128xf32>
    %6 = arith.addf %3, %5 : vector<128x128xf32>
    %cst = arith.constant 0.000000e+00 : f32
    %7 = vector.broadcast %cst : f32 to vector<128x128xf32>
    %8 = arith.maximumf %6, %7 : vector<128x128xf32>
    %9 = arith.truncf %8 : vector<128x128xf32> to vector<128x128xbf16>
    %c0_5 = arith.constant 0 : index
    %c0_6 = arith.constant 0 : index
    %10 = vector.load %arg4[%c0_5, %c0_6] : memref<128x128xbf16, #tpu.memory_space<vmem>>, vector<128x128xbf16>
    tpu.vector_store %arg4[%c0_5, %c0_6], %9 {strides = array<i32>} : memref<128x128xbf16, #tpu.memory_space<vmem>>, vector<128x128xbf16>,
    return
  }
  func.func @transform_0(%arg0: i32) -> (i32, i32) {
    %c0_i32 = arith.constant 0 : i32
    %c0_i32_0 = arith.constant 0 : i32
    return %arg0, %c0_i32 : i32, i32
  }
  func.func @transform_1(%arg0: i32) -> (i32, i32) {
    %c0_i32 = arith.constant 0 : i32
    %c0_i32_0 = arith.constant 0 : i32
    %c0_i32_1 = arith.constant 0 : i32
    return %c0_i32, %c0_i32_0 : i32, i32
  }
  func.func @transform_2(%arg0: i32) -> (i32, i32) {
    %c0_i32 = arith.constant 0 : i32
    %c0_i32_0 = arith.constant 0 : i32
    %c0_i32_1 = arith.constant 0 : i32
    return %c0_i32, %c0_i32_0 : i32, i32
  }
  func.func @transform_3(%arg0: i32) -> (i32, i32) {
    %c0_i32 = arith.constant 0 : i32
    %c0_i32_0 = arith.constant 0 : i32
    return %arg0, %c0_i32 : i32, i32
  }
}

module attributes {stable_mosaic.version = 11 : i64} {
  func.func @_matmul_stats_kernel(%arg0: i32, %arg1: i32, %arg2: memref<1x32x128xbf16, #tpu.memory_space<vmem>>, %arg3: memref<1x128x128xbf16, #tpu.memory_space<vmem>>, %arg4: memref<1x32x128xf32, #tpu.memory_space<vmem>>, %arg5: memref<1x1x2x128xf32, #tpu.memory_space<vmem>>) attributes {dimension_semantics = [#tpu.dimension_semantics<parallel>, #tpu.dimension_semantics<parallel>], iteration_bounds = array<i64: 4, 1>, scalar_prefetch = 0 : i64, scratch_operands = 0 : i64, tpu.core_type = #tpu.core_type<tc>, window_params = [{transform_indices = @transform_0, window_bounds = array<i64: 1, 32, 128>}, {transform_indices = @transform_1, window_bounds = array<i64: 1, 128, 128>}, {transform_indices = @transform_2, window_bounds = array<i64: 1, 32, 128>}, {transform_indices = @transform_3, window_bounds = array<i64: 1, 1, 2, 128>}]} {
    %c0 = arith.constant 0 : index
    %c0_0 = arith.constant 0 : index
    %c0_1 = arith.constant 0 : index
    %0 = vector.load %arg2[%c0, %c0_0, %c0_1] : memref<1x32x128xbf16, #tpu.memory_space<vmem>>, vector<1x32x128xbf16>
    %1 = vector.shape_cast %0 : vector<1x32x128xbf16> to vector<32x128xbf16>
    %c0_2 = arith.constant 0 : index
    %c0_3 = arith.constant 0 : index
    %c0_4 = arith.constant 0 : index
    %2 = vector.load %arg3[%c0_2, %c0_3, %c0_4] : memref<1x128x128xbf16, #tpu.memory_space<vmem>>, vector<1x128x128xbf16>
    %3 = vector.shape_cast %2 : vector<1x128x128xbf16> to vector<128x128xbf16>
    %cst = arith.constant dense<0.000000e+00> : vector<32x128xf32>
    %4 = tpu.matmul %1, %3, %cst {dimension_numbers = #tpu.dot_dimension_numbers<[1], [0], [0], [1], [0, 0, 1, 1], [], []>} : vector<32x128xbf16>, vector<128x128xbf16>, vector<32x128xf32> -> vector<32x128xf32>
    %c0_5 = arith.constant 0 : index
    %c0_6 = arith.constant 0 : index
    %c0_7 = arith.constant 0 : index
    %5 = vector.load %arg4[%c0_5, %c0_6, %c0_7] : memref<1x32x128xf32, #tpu.memory_space<vmem>>, vector<1x32x128xf32>
    %6 = vector.shape_cast %5 : vector<1x32x128xf32> to vector<32x128xf32>
    %7 = vector.shape_cast %4 : vector<32x128xf32> to vector<1x32x128xf32>
    tpu.vector_store %arg4[%c0_5, %c0_6, %c0_7], %7 {strides = array<i32>} : memref<1x32x128xf32, #tpu.memory_space<vmem>>, vector<1x32x128xf32>,
    %cst_8 = arith.constant dense<0.000000e+00> : vector<128xf32>
    %8 = vector.multi_reduction <add>, %4, %cst_8 [0] : vector<32x128xf32> to vector<128xf32>
    %9 = vector.shape_cast %8 : vector<128xf32> to vector<1x128xf32>
    %c0_9 = arith.constant 0 : index
    %c0_10 = arith.constant 0 : index
    %c0_11 = arith.constant 0 : index
    %c0_12 = arith.constant 0 : index
    %10 = vector.load %arg5[%c0_9, %c0_10, %c0_11, %c0_12] : memref<1x1x2x128xf32, #tpu.memory_space<vmem>>, vector<1x1x1x128xf32>
    %11 = vector.shape_cast %10 : vector<1x1x1x128xf32> to vector<1x128xf32>
    %12 = vector.shape_cast %9 : vector<1x128xf32> to vector<1x1x1x128xf32>
    tpu.vector_store %arg5[%c0_9, %c0_10, %c0_11, %c0_12], %12 {strides = array<i32>} : memref<1x1x2x128xf32, #tpu.memory_space<vmem>>, vector<1x1x1x128xf32>,
    %13 = arith.mulf %4, %4 : vector<32x128xf32>
    %cst_13 = arith.constant dense<0.000000e+00> : vector<128xf32>
    %14 = vector.multi_reduction <add>, %13, %cst_13 [0] : vector<32x128xf32> to vector<128xf32>
    %15 = vector.shape_cast %14 : vector<128xf32> to vector<1x128xf32>
    %c0_14 = arith.constant 0 : index
    %c0_15 = arith.constant 0 : index
    %c1 = arith.constant 1 : index
    %c0_16 = arith.constant 0 : index
    %16 = vector.load %arg5[%c0_14, %c0_15, %c1, %c0_16] : memref<1x1x2x128xf32, #tpu.memory_space<vmem>>, vector<1x1x1x128xf32>
    %17 = vector.shape_cast %16 : vector<1x1x1x128xf32> to vector<1x128xf32>
    %18 = vector.shape_cast %15 : vector<1x128xf32> to vector<1x1x1x128xf32>
    tpu.vector_store %arg5[%c0_14, %c0_15, %c1, %c0_16], %18 {strides = array<i32>} : memref<1x1x2x128xf32, #tpu.memory_space<vmem>>, vector<1x1x1x128xf32>,
    return
  }
  func.func @transform_0(%arg0: i32, %arg1: i32) -> (i32, i32, i32) {
    %c0_i32 = arith.constant 0 : i32
    %c0_i32_0 = arith.constant 0 : i32
    return %arg0, %arg1, %c0_i32 : i32, i32, i32
  }
  func.func @transform_1(%arg0: i32, %arg1: i32) -> (i32, i32, i32) {
    %c0_i32 = arith.constant 0 : i32
    %c0_i32_0 = arith.constant 0 : i32
    %c0_i32_1 = arith.constant 0 : i32
    return %arg0, %c0_i32, %c0_i32_0 : i32, i32, i32
  }
  func.func @transform_2(%arg0: i32, %arg1: i32) -> (i32, i32, i32) {
    %c0_i32 = arith.constant 0 : i32
    %c0_i32_0 = arith.constant 0 : i32
    return %arg0, %arg1, %c0_i32 : i32, i32, i32
  }
  func.func @transform_3(%arg0: i32, %arg1: i32) -> (i32, i32, i32, i32) {
    %c0_i32 = arith.constant 0 : i32
    %c0_i32_0 = arith.constant 0 : i32
    %c0_i32_1 = arith.constant 0 : i32
    return %arg0, %arg1, %c0_i32, %c0_i32_0 : i32, i32, i32, i32
  }
}

module attributes {stable_mosaic.version = 11 : i64} {
  func.func @_matmul_tanh_kernel(%arg0: i32, %arg1: i32, %arg2: memref<1x128x64xbf16, #tpu.memory_space<vmem>>, %arg3: memref<1x64x128xbf16, #tpu.memory_space<vmem>>, %arg4: memref<1x128x128xf32, #tpu.memory_space<vmem>>) attributes {dimension_semantics = [#tpu.dimension_semantics<parallel>, #tpu.dimension_semantics<parallel>], iteration_bounds = array<i64: 4, 1>, scalar_prefetch = 0 : i64, scratch_operands = 0 : i64, tpu.core_type = #tpu.core_type<tc>, window_params = [{transform_indices = @transform_0, window_bounds = array<i64: 1, 128, 64>}, {transform_indices = @transform_1, window_bounds = array<i64: 1, 64, 128>}, {transform_indices = @transform_2, window_bounds = array<i64: 1, 128, 128>}]} {
    %c0 = arith.constant 0 : index
    %c0_0 = arith.constant 0 : index
    %c0_1 = arith.constant 0 : index
    %0 = vector.load %arg2[%c0, %c0_0, %c0_1] : memref<1x128x64xbf16, #tpu.memory_space<vmem>>, vector<1x128x64xbf16>
    %1 = vector.shape_cast %0 : vector<1x128x64xbf16> to vector<128x64xbf16>
    %c0_2 = arith.constant 0 : index
    %c0_3 = arith.constant 0 : index
    %c0_4 = arith.constant 0 : index
    %2 = vector.load %arg3[%c0_2, %c0_3, %c0_4] : memref<1x64x128xbf16, #tpu.memory_space<vmem>>, vector<1x64x128xbf16>
    %3 = vector.shape_cast %2 : vector<1x64x128xbf16> to vector<64x128xbf16>
    %cst = arith.constant dense<0.000000e+00> : vector<128x128xf32>
    %4 = tpu.matmul %1, %3, %cst {dimension_numbers = #tpu.dot_dimension_numbers<[1], [0], [0], [1], [0, 0, 1, 1], [], []>} : vector<128x64xbf16>, vector<64x128xbf16>, vector<128x128xf32> -> vector<128x128xf32>
    %5 = math.tanh %4 : vector<128x128xf32>
    %c0_5 = arith.constant 0 : index
    %c0_6 = arith.constant 0 : index
    %c0_7 = arith.constant 0 : index
    %6 = vector.load %arg4[%c0_5, %c0_6, %c0_7] : memref<1x128x128xf32, #tpu.memory_space<vmem>>, vector<1x128x128xf32>
    %7 = vector.shape_cast %6 : vector<1x128x128xf32> to vector<128x128xf32>
    %8 = vector.shape_cast %5 : vector<128x128xf32> to vector<1x128x128xf32>
    tpu.vector_store %arg4[%c0_5, %c0_6, %c0_7], %8 {strides = array<i32>} : memref<1x128x128xf32, #tpu.memory_space<vmem>>, vector<1x128x128xf32>,
    return
  }
  func.func @transform_0(%arg0: i32, %arg1: i32) -> (i32, i32, i32) {
    %c0_i32 = arith.constant 0 : i32
    %c0_i32_0 = arith.constant 0 : i32
    return %arg0, %arg1, %c0_i32 : i32, i32, i32
  }
  func.func @transform_1(%arg0: i32, %arg1: i32) -> (i32, i32, i32) {
    %c0_i32 = arith.constant 0 : i32
    %c0_i32_0 = arith.constant 0 : i32
    %c0_i32_1 = arith.constant 0 : i32
    return %arg0, %c0_i32, %c0_i32_0 : i32, i32, i32
  }
  func.func @transform_2(%arg0: i32, %arg1: i32) -> (i32, i32, i32) {
    %c0_i32 = arith.constant 0 : i32
    %c0_i32_0 = arith.constant 0 : i32
    return %arg0, %arg1, %c0_i32 : i32, i32, i32
  }
}

</mosaic_0001>

<bundles_post_ra>
// kernel: _lambda_.5
= control target key start
LH: loop header
LB: loop body
LE: loop exit
PB: predicated region body
PF: predicated region fallthrough
CT: control target
= control target key end

     0   :  { %s519_s12 = smov 0   ;;  %s521_s13 = smov 0   ;;  %s562_s0 = inlined_call_operand.vmem [shape: bf16[1,2,64], index: 0, kind: input, shape index: {}]   ;;  %s563_s1 = inlined_call_operand.vmem [shape: bf16[16,64,128], index: 1, kind: input, shape index: {}]   ;;  %s564_s2 = inlined_call_operand.vmem [shape: f32[16,2,128], index: 2, kind: output, shape index: {0}]   ;;  %s565_s3 = inlined_call_operand.vmem [shape: f32[16,1,2,128], index: 3, kind: output, shape index: {1}]  }
   0x1   :  { %s523_s14 = smov 0  }
   0x2 LB: > { %s26_s15 = sadd.s32 1, %s493_s13  ;;  %p422_p0 = scmp.ge.s32.totalorder %s497_s14, 1  ;;  %s497_s14 = sphi %s523_s14, %s14_s14   ;;  %s493_s13 = sphi %s521_s13, %s567_s13   ;;  %s489_s12 = sphi %s519_s12, %s566_s12  }
   0x3   : > { %p28_p1 = scmp.ge.s32.totalorder %s26_s15, 16  ;;  %p164_p2 = scmp.lt.s32.totalorder %s497_s14, 17 }
   0x5   : > { %s569_s15 = smov (%p28_p1, %s26_s15), 0  ;;  %p165_p3 = pnand %p422_p0, %p164_p2 }
   0x6   : > { %p203_p4 = scmp.lt.s32.totalorder (!%p165_p3), %s489_s12, 15 }
   0x7   : > { %168 = sbr.rel (%p165_p3) target bundleno = 173 (0xad), region = 28 }
   0xc   : > { %s571_s12 = smov (!%p203_p4, %s489_s12), 15  ;;  %v223_v4 = vld [vmem:[%s562_s0] sm:$0x1]  ;;  %vm256_vm0 = vcmask 523264   ;;  %vm274_vm1 = vcmask 1041408  }
   0xd   : > { %s446_s16 = sshll.u32 %s571_s12, 5  ;;  %s425_s22 = sshll.u32 %s571_s12, 1 }
   0xe   : > { %s207_s19 = scalar_lea.vmem %s563_s1, %s446_s16  ;;  %s214_s25 = scalar_lea.vmem %s564_s2, %s425_s22 }
   0xf   : > { %v450_v0 = vld [vmem:[%s207_s19 + $0x18] sm:$0xff]  ;;  %v449_v1 = vld [vmem:[%s207_s19 + $0x10] sm:$0xff]  ;;  %v448_v2 = vld [vmem:[%s207_s19 + $0x8] sm:$0xff]  ;;  %s221_s28 = scalar_lea.vmem %s565_s3, %s425_s22 }
  0x10   : > { %264 = vmatpush.bf16.msra.mxu0 %v450_v0  ;;  %v447_v3 = vld [vmem:[%s207_s19] sm:$0xff] }
  0x14   : > { %265 = vmatpush.bf16.msra.mxu0 %v449_v1 }
  0x18   : > { %266 = vmatpush.bf16.msra.mxu0 %v448_v2 }
  0x1c   : > { %267 = vmatpush.bf16.msra.mxu0 %v447_v3 }
  0x1f   : > { %443 = vmatmul.msk.bf16.vlgmr.msra.gmra.mxu0 %vm256_vm0, %v223_v4 }
  0x9c   : > { %v269_v5 = vpop.f32.mrf.mxu0 }
  0x9d   : > { %273 = vst [vmem:[%s214_s25] sm:$0x3] %v269_v5  ;;  %v275_v6 = vsel %vm274_vm1, %v269_v5, 0.0  ;;  %v283_v7 = vmul.f32 %v269_v5, %v269_v5 }
  0x9e   : > { %v276_v8 = vrot.slane %v275_v6, 4 }
  0x9f   : > { %v284_v9 = vsel %vm274_vm1, %v283_v7, 0.0 }
  0xa0   : > { %v277_v10 = vadd.f32 %v276_v8, %v275_v6  ;;  %v285_v11 = vrot.slane %v284_v9, 4 }
  0xa2   : > { %v278_v12 = vrot.slane %v277_v10, 2  ;;  %v286_v13 = vadd.f32 %v285_v11, %v284_v9 }
  0xa4   : > { %v279_v14 = vadd.f32 %v278_v12, %v277_v10  ;;  %v287_v15 = vrot.slane %v286_v13, 2  ;;  %v271_v16 = vpop.f32.mrf.mxu0 }
  0xa6   : > { %v280_v17 = vrot.slane %v279_v14, 1  ;;  %v288_v18 = vadd.f32 %v287_v15, %v286_v13 }
  0xa8   : > { %v281_v19 = vadd.f32 %v280_v17, %v279_v14  ;;  %v289_v20 = vrot.slane %v288_v18, 1 }
  0xaa   : > { %282 = vst [vmem:[%s221_s28] sm:$0x1] %v281_v19  ;;  %v290_v21 = vadd.f32 %v289_v20, %v288_v18 }
  0xac   : > { %291 = vst [vmem:[%s221_s28 + $0x1] sm:$0x1] %v290_v21 }
  0xad PF: > { %s14_s14 = sadd.s32 1, %s497_s14   ;;  %s566_s12 = smov %s493_s13 }
  0xae   : > { %p11_p5 = scmp.ge.s32.totalorder %s14_s14, 18   ;;  %s567_s13 = smov %s569_s15 }
  0xb0   :  { %13 = sbr.rel (!%p11_p5) target bundleno = 2 (0x2), region = 73 }

// kernel: _lambda_.6
= control target key start
LH: loop header
LB: loop body
LE: loop exit
PB: predicated region body
PF: predicated region fallthrough
CT: control target
= control target key end

     0   :  { %s107_s0 = inlined_call_operand.vmem [shape: f32[32,128], index: 0, kind: input, shape index: {}]   ;;  %s108_s1 = inlined_call_operand.vmem [shape: f32[1,128], index: 1, kind: input, shape index: {}]   ;;  %s109_s2 = inlined_call_operand.vmem [shape: f32[1,128], index: 2, kind: input, shape index: {}]   ;;  %s110_s3 = inlined_call_operand.vmem [shape: bf16[32,128], index: 3, kind: output, shape index: {}]  }
   0x1   :  { %v14_v0 = vld [vmem:[%s107_s0] sm:$0xff]  ;;  %v15_v1 = vld [vmem:[%s107_s0 + $0x8] sm:$0xff]  ;;  %v16_v4 = vld [vmem:[%s107_s0 + $0x10] sm:$0xff] }
   0x2   :  { %v61_v2 = vld [vmem:[%s108_s1] ss:$0 sm:$0xff]  ;;  %v17_v5 = vld [vmem:[%s107_s0 + $0x18] sm:$0xff] }
   0x3   :  { %v62_v3 = vld [vmem:[%s109_s2] ss:$0 sm:$0xff]  ;;  %v22_v6 = vmul.f32 %v61_v2, %v14_v0  ;;  %v23_v7 = vmul.f32 %v61_v2, %v15_v1  ;;  %v24_v8 = vmul.f32 %v61_v2, %v16_v4  ;;  %v25_v9 = vmul.f32 %v61_v2, %v17_v5 }
   0x5   :  { %v30_v10 = vadd.f32 %v62_v3, %v22_v6  ;;  %v31_v11 = vadd.f32 %v62_v3, %v23_v7  ;;  %v32_v12 = vadd.f32 %v62_v3, %v24_v8  ;;  %v33_v13 = vadd.f32 %v62_v3, %v25_v9 }
   0x7   :  { %v34_v14 = vmax.f32 %v30_v10, 0.0  ;;  %v35_v15 = vmax.f32 %v31_v11, 0.0  ;;  %v36_v16 = vmax.f32 %v32_v12, 0.0  ;;  %v37_v17 = vmax.f32 %v33_v13, 0.0 }
   0x9   :  { %v53_v18 = vpack.c.bf16 %v35_v15, %v34_v14  ;;  %v58_v19 = vpack.c.bf16 %v37_v17, %v36_v16 }
   0xb   :  { %54 = vst [vmem:[%s110_s3] sm:$0xff] %v53_v18  }
   0xc   :  { %60 = vst [vmem:[%s110_s3 + $0x8] sm:$0xff] %v58_v19  }

// kernel: _lambda_.8
= control target key start
LH: loop header
LB: loop body
LE: loop exit
PB: predicated region body
PF: predicated region fallthrough
CT: control target
= control target key end

     0   :  { %s287_s0 = inlined_call_operand.vmem [shape: f32[128,128], index: 0, kind: input, shape index: {}]   ;;  %s288_s1 = inlined_call_operand.vmem [shape: f32[1,128], index: 1, kind: input, shape index: {}]   ;;  %s289_s2 = inlined_call_operand.vmem [shape: f32[1,128], index: 2, kind: input, shape index: {}]   ;;  %s290_s3 = inlined_call_operand.vmem [shape: bf16[128,128], index: 3, kind: output, shape index: {}]  }
   0x1   :  { %v14_v0 = vld [vmem:[%s287_s0] sm:$0xff]  ;;  %v15_v1 = vld [vmem:[%s287_s0 + $0x8] sm:$0xff]  ;;  %v16_v4 = vld [vmem:[%s287_s0 + $0x10] sm:$0xff] }
   0x2   :  { %v169_v2 = vld [vmem:[%s288_s1] ss:$0 sm:$0xff]  ;;  %v17_v5 = vld [vmem:[%s287_s0 + $0x18] sm:$0xff]  ;;  %v19_v11 = vld [vmem:[%s287_s0 + $0x28] sm:$0xff] }
   0x3   :  { %v203_v3 = vld [vmem:[%s289_s2] ss:$0 sm:$0xff]  ;;  %v34_v7 = vmul.f32 %v169_v2, %v14_v0  ;;  %v35_v8 = vmul.f32 %v169_v2, %v15_v1  ;;  %v36_v9 = vmul.f32 %v169_v2, %v16_v4  ;;  %v37_v10 = vmul.f32 %v169_v2, %v17_v5  ;;  %v20_v12 = vld [vmem:[%s287_s0 + $0x30] sm:$0xff]  ;;  %v21_v13 = vld [vmem:[%s287_s0 + $0x38] sm:$0xff] }
   0x4   :  { %v18_v6 = vld [vmem:[%s287_s0 + $0x20] sm:$0xff]  ;;  %v39_v15 = vmul.f32 %v169_v2, %v19_v11  ;;  %v40_v16 = vmul.f32 %v169_v2, %v20_v12  ;;  %v41_v17 = vmul.f32 %v169_v2, %v21_v13  ;;  %v23_v27 = vld [vmem:[%s287_s0 + $0x48] sm:$0xff]  ;;  %v24_v32 = vld [vmem:[%s287_s0 + $0x50] sm:$0xff] }
   0x5   :  { %v38_v14 = vmul.f32 %v169_v2, %v18_v6  ;;  %v54_v18 = vadd.f32 %v203_v3, %v34_v7  ;;  %v55_v19 = vadd.f32 %v203_v3, %v35_v8  ;;  %v56_v20 = vadd.f32 %v203_v3, %v36_v9  ;;  %v22_v26 = vld [vmem:[%s287_s0 + $0x40] sm:$0xff]  ;;  %v25_v33 = vld [vmem:[%s287_s0 + $0x58] sm:$0xff]  ;;  %v27_v39 = vld [vmem:[%s287_s0 + $0x68] sm:$0xff] }
   0x6   :  { %v57_v21 = vadd.f32 %v203_v3, %v37_v10  ;;  %v59_v23 = vadd.f32 %v203_v3, %v39_v15  ;;  %v60_v24 = vadd.f32 %v203_v3, %v40_v16  ;;  %v61_v25 = vadd.f32 %v203_v3, %v41_v17  ;;  %v26_v38 = vld [vmem:[%s287_s0 + $0x60] sm:$0xff]  ;;  %v28_v44 = vld [vmem:[%s287_s0 + $0x70] sm:$0xff]  ;;  %v29_v45 = vld [vmem:[%s287_s0 + $0x78] sm:$0xff] }
   0x7   :  { %v58_v22 = vadd.f32 %v203_v3, %v38_v14  ;;  %v70_v28 = vmax.f32 %v54_v18, 0.0  ;;  %v71_v29 = vmax.f32 %v55_v19, 0.0  ;;  %v72_v30 = vmax.f32 %v56_v20, 0.0 }
   0x8   :  { %v73_v31 = vmax.f32 %v57_v21, 0.0  ;;  %v75_v35 = vmax.f32 %v59_v23, 0.0  ;;  %v76_v36 = vmax.f32 %v60_v24, 0.0  ;;  %v77_v37 = vmax.f32 %v61_v25, 0.0 }
   0x9   :  { %v74_v34 = vmax.f32 %v58_v22, 0.0  ;;  %v125_v40 = vpack.c.bf16 %v71_v29, %v70_v28  ;;  %v42_v42 = vmul.f32 %v169_v2, %v22_v26  ;;  %v43_v43 = vmul.f32 %v169_v2, %v23_v27 }
   0xa   :  { %v130_v41 = vpack.c.bf16 %v73_v31, %v72_v30  ;;  %v140_v47 = vpack.c.bf16 %v77_v37, %v76_v36  ;;  %v44_v48 = vmul.f32 %v169_v2, %v24_v32  ;;  %v45_v49 = vmul.f32 %v169_v2, %v25_v33 }
   0xb   :  { %v135_v46 = vpack.c.bf16 %v75_v35, %v74_v34  ;;  %126 = vst [vmem:[%s290_s3] sm:$0xff] %v125_v40   ;;  %v62_v50 = vadd.f32 %v203_v3, %v42_v42  ;;  %v63_v51 = vadd.f32 %v203_v3, %v43_v43  ;;  %v46_v52 = vmul.f32 %v169_v2, %v26_v38 }
   0xc   :  { %v47_v53 = vmul.f32 %v169_v2, %v27_v39  ;;  %162 = vst [vmem:[%s290_s3 + $0x8] sm:$0xff] %v130_v41   ;;  %v64_v54 = vadd.f32 %v203_v3, %v44_v48  ;;  %v65_v55 = vadd.f32 %v203_v3, %v45_v49  ;;  %v48_v56 = vmul.f32 %v169_v2, %v28_v44 }
   0xd   :  { %v49_v57 = vmul.f32 %v169_v2, %v29_v45  ;;  %163 = vst [vmem:[%s290_s3 + $0x10] sm:$0xff] %v135_v46   ;;  %v78_v58 = vmax.f32 %v62_v50, 0.0  ;;  %v79_v59 = vmax.f32 %v63_v51, 0.0  ;;  %v66_v60 = vadd.f32 %v203_v3, %v46_v52 }
   0xe   :  { %v67_v61 = vadd.f32 %v203_v3, %v47_v53  ;;  %164 = vst [vmem:[%s290_s3 + $0x18] sm:$0xff] %v140_v47   ;;  %v80_v62 = vmax.f32 %v64_v54, 0.0  ;;  %v81_v63 = vmax.f32 %v65_v55, 0.0  ;;  %v68_v0 = vadd.f32 %v203_v3, %v48_v56 }
   0xf   :  { %v69_v1 = vadd.f32 %v203_v3, %v49_v57  ;;  %v145_v2 = vpack.c.bf16 %v79_v59, %v78_v58  ;;  %v82_v4 = vmax.f32 %v66_v60, 0.0 }
  0x10   :  { %v83_v5 = vmax.f32 %v67_v61, 0.0  ;;  %v150_v6 = vpack.c.bf16 %v81_v63, %v80_v62  ;;  %v84_v7 = vmax.f32 %v68_v0, 0.0 }
  0x11   :  { %v85_v8 = vmax.f32 %v69_v1, 0.0  ;;  %165 = vst [vmem:[%s290_s3 + $0x20] sm:$0xff] %v145_v2  }
  0x12   :  { %v155_v9 = vpack.c.bf16 %v83_v5, %v82_v4  ;;  %166 = vst [vmem:[%s290_s3 + $0x28] sm:$0xff] %v150_v6  }
  0x13   :  { %v160_v10 = vpack.c.bf16 %v85_v8, %v84_v7 }
  0x14   :  { %167 = vst [vmem:[%s290_s3 + $0x30] sm:$0xff] %v155_v9  }
  0x15   :  { %168 = vst [vmem:[%s290_s3 + $0x38] sm:$0xff] %v160_v10  }

// kernel: _lambda_.7
= control target key start
LH: loop header
LB: loop body
LE: loop exit
PB: predicated region body
PF: predicated region fallthrough
CT: control target
= control target key end

     0   :  { %s659_s12 = smov 0   ;;  %s661_s13 = smov 0   ;;  %s704_s0 = inlined_call_operand.vmem [shape: bf16[4,32,128], index: 0, kind: input, shape index: {}]   ;;  %s705_s1 = inlined_call_operand.vmem [shape: bf16[4,128,128], index: 1, kind: input, shape index: {}]   ;;  %s706_s2 = inlined_call_operand.vmem [shape: f32[4,32,128], index: 2, kind: output, shape index: {0}]   ;;  %s707_s3 = inlined_call_operand.vmem [shape: f32[4,1,2,128], index: 3, kind: output, shape index: {1}]  }
   0x1   :  { %s663_s14 = smov 0  }
   0x2 LB: > { %s26_s15 = sadd.s32 1, %s633_s13  ;;  %p520_p0 = scmp.ge.s32.totalorder %s637_s14, 1  ;;  %s637_s14 = sphi %s663_s14, %s14_s14   ;;  %s633_s13 = sphi %s661_s13, %s709_s13   ;;  %s629_s12 = sphi %s659_s12, %s708_s12  }
   0x3   : > { %p28_p1 = scmp.ge.s32.totalorder %s26_s15, 4  ;;  %p173_p2 = scmp.lt.s32.totalorder %s637_s14, 5 }
   0x5   : > { %s711_s15 = smov (%p28_p1, %s26_s15), 0  ;;  %p174_p3 = pnand %p520_p0, %p173_p2 }
   0x6   : > { %p218_p4 = scmp.lt.s32.totalorder (!%p174_p3), %s629_s12, 3 }
   0x7   : > { %177 = sbr.rel (%p174_p3) target bundleno = 202 (0xca), region = 28 }
   0xc   : > { %s713_s12 = smov (!%p218_p4, %s629_s12), 3 }
   0xd   : > { %s571_s16 = sshll.u32 %s713_s12, 6  ;;  %s570_s20 = sshll.u32 %s713_s12, 4 }
   0xe   : > { %s231_s19 = scalar_lea.vmem %s705_s1, %s571_s16  ;;  %s225_s23 = scalar_lea.vmem %s704_s0, %s570_s20 }
   0xf   : > { %v582_v0 = vld [vmem:[%s231_s19 + $0x38] sm:$0xff]  ;;  %v581_v1 = vld [vmem:[%s231_s19 + $0x30] sm:$0xff]  ;;  %v580_v2 = vld [vmem:[%s231_s19 + $0x28] sm:$0xff]  ;;  %s572_s24 = sshll.u32 %s713_s12, 5  ;;  %s527_s28 = sshll.u32 %s713_s12, 1 }
  0x10   : > { %329 = vmatpush.bf16.msra.mxu0 %v582_v0  ;;  %583 = vmatpush.bf16.msra.mxu1 %v582_v0  ;;  %v579_v3 = vld [vmem:[%s231_s19 + $0x20] sm:$0xff]  ;;  %v578_v4 = vld [vmem:[%s231_s19 + $0x18] sm:$0xff]  ;;  %v577_v5 = vld [vmem:[%s231_s19 + $0x10] sm:$0xff]  ;;  %s240_s27 = scalar_lea.vmem %s706_s2, %s572_s24  ;;  %s248_s4 = scalar_lea.vmem %s707_s3, %s527_s28 }
  0x11   : > { %v576_v6 = vld [vmem:[%s231_s19 + $0x8] sm:$0xff]  ;;  %v575_v7 = vld [vmem:[%s231_s19] sm:$0xff] }
  0x12   : > { %v573_v8 = vld [vmem:[%s225_s23] sm:$0xff]  ;;  %v574_v9 = vld [vmem:[%s225_s23 + $0x8] sm:$0xff] }
  0x14   : > { %330 = vmatpush.bf16.msra.mxu0 %v581_v1  ;;  %584 = vmatpush.bf16.msra.mxu1 %v581_v1 }
  0x18   : > { %331 = vmatpush.bf16.msra.mxu0 %v580_v2  ;;  %585 = vmatpush.bf16.msra.mxu1 %v580_v2 }
  0x1c   : > { %332 = vmatpush.bf16.msra.mxu0 %v579_v3  ;;  %586 = vmatpush.bf16.msra.mxu1 %v579_v3 }
  0x20   : > { %333 = vmatpush.bf16.msra.mxu0 %v578_v4  ;;  %587 = vmatpush.bf16.msra.mxu1 %v578_v4 }
  0x24   : > { %334 = vmatpush.bf16.msra.mxu0 %v577_v5  ;;  %588 = vmatpush.bf16.msra.mxu1 %v577_v5 }
  0x28   : > { %335 = vmatpush.bf16.msra.mxu0 %v576_v6  ;;  %589 = vmatpush.bf16.msra.mxu1 %v576_v6 }
  0x2c   : > { %336 = vmatpush.bf16.msra.mxu0 %v575_v7  ;;  %590 = vmatpush.bf16.msra.mxu1 %v575_v7 }
  0x2f   : > { %337 = vmatmul.bf16.vlgmr.msra.gmra.mxu0 %v573_v8  ;;  %342 = vmatmul.bf16.vlgmr.msra.gmra.mxu1 %v574_v9 }
  0xac   : > { %v338_v10 = vpop.f32.mrf.mxu0  ;;  %v343_v11 = vpop.f32.mrf.mxu1 }
  0xad   : > { %348 = vst [vmem:[%s240_s27] sm:$0xff] %v338_v10  ;;  %v362_v14 = vmul.f32 %v338_v10, %v338_v10  ;;  %v364_v17 = vmul.f32 %v343_v11, %v343_v11 }
  0xae   : > { %350 = vst [vmem:[%s240_s27 + $0x10] sm:$0xff] %v343_v11 }
  0xb4   : > { %v340_v12 = vpop.f32.mrf.mxu0  ;;  %v345_v13 = vpop.f32.mrf.mxu1 }
  0xb5   : > { %349 = vst [vmem:[%s240_s27 + $0x8] sm:$0xff] %v340_v12  ;;  %v352_v15 = vadd.f32 %v340_v12, %v338_v10  ;;  %v363_v16 = vmul.f32 %v340_v12, %v340_v12  ;;  %v365_v21 = vmul.f32 %v345_v13, %v345_v13 }
  0xb6   : > { %351 = vst [vmem:[%s240_s27 + $0x18] sm:$0xff] %v345_v13 }
  0xb7   : > { %v366_v18 = vadd.f32 %v363_v16, %v362_v14  ;;  %v353_v19 = vadd.f32 %v352_v15, %v343_v11 }
  0xb9   : > { %v354_v20 = vadd.f32 %v353_v19, %v345_v13  ;;  %v367_v22 = vadd.f32 %v366_v18, %v364_v17 }
  0xbb   : > { %v355_v23 = vrot.slane %v354_v20, 4  ;;  %v368_v24 = vadd.f32 %v367_v22, %v365_v21 }
  0xbd   : > { %v356_v25 = vadd.f32 %v355_v23, %v354_v20  ;;  %v369_v26 = vrot.slane %v368_v24, 4 }
  0xbf   : > { %v357_v27 = vrot.slane %v356_v25, 2  ;;  %v370_v28 = vadd.f32 %v369_v26, %v368_v24 }
  0xc1   : > { %v358_v29 = vadd.f32 %v357_v27, %v356_v25  ;;  %v371_v30 = vrot.slane %v370_v28, 2 }
  0xc3   : > { %v359_v31 = vrot.slane %v358_v29, 1  ;;  %v372_v32 = vadd.f32 %v371_v30, %v370_v28 }
  0xc5   : > { %v360_v33 = vadd.f32 %v359_v31, %v358_v29  ;;  %v373_v34 = vrot.slane %v372_v32, 1 }
  0xc7   : > { %361 = vst [vmem:[%s248_s4] sm:$0x1] %v360_v33  ;;  %v374_v35 = vadd.f32 %v373_v34, %v372_v32 }
  0xc9   : > { %375 = vst [vmem:[%s248_s4 + $0x1] sm:$0x1] %v374_v35 }
  0xca PF: > { %s14_s14 = sadd.s32 1, %s637_s14   ;;  %s708_s12 = smov %s633_s13 }
  0xcb   : > { %p11_p5 = scmp.ge.s32.totalorder %s14_s14, 6   ;;  %s709_s13 = smov %s711_s15 }
  0xcd   :  { %13 = sbr.rel (!%p11_p5) target bundleno = 2 (0x2), region = 73 }

// kernel: _lambda_.9
= control target key start
LH: loop header
LB: loop body
LE: loop exit
PB: predicated region body
PF: predicated region fallthrough
CT: control target
= control target key end

     0   :  { %s688_s9 = smov 0   ;;  %s690_s10 = smov 0   ;;  %s755_s0 = inlined_call_operand.vmem [shape: bf16[4,128,64], index: 0, kind: input, shape index: {}]   ;;  %s756_s1 = inlined_call_operand.vmem [shape: bf16[4,64,128], index: 1, kind: input, shape index: {}]   ;;  %s757_s2 = inlined_call_operand.vmem [shape: f32[4,128,128], index: 2, kind: output, shape index: {}]  }
   0x1   :  { %s692_s11 = smov 0  }
   0x2 LB: > { %s24_s12 = sadd.s32 1, %s667_s10  ;;  %p501_p0 = scmp.ge.s32.totalorder %s671_s11, 1  ;;  %s671_s11 = sphi %s692_s11, %s12_s11   ;;  %s667_s10 = sphi %s690_s10, %s759_s10   ;;  %s663_s9 = sphi %s688_s9, %s758_s9  }
   0x3   : > { %p26_p1 = scmp.ge.s32.totalorder %s24_s12, 4  ;;  %p143_p2 = scmp.lt.s32.totalorder %s671_s11, 5 }
   0x5   : > { %s761_s12 = smov (%p26_p1, %s24_s12), 0  ;;  %p144_p3 = pnand %p501_p0, %p143_p2 }
   0x6   : > { %p179_p4 = scmp.lt.s32.totalorder (!%p144_p3), %s663_s9, 3 }
   0x7   : > { %147 = sbr.rel (%p144_p3) target bundleno = 197 (0xc5), region = 28 }
   0xc   : > { %s763_s9 = smov (!%p179_p4, %s663_s9), 3  ;;  %vm292_vm0 = vcmask 523264  }
   0xd   : > { %s567_s13 = sshll.u32 %s763_s9, 5  ;;  %s566_s17 = sshll.u32 %s763_s9, 6 }
   0xe   : > { %s192_s16 = scalar_lea.vmem %s756_s1, %s567_s13  ;;  %s186_s20 = scalar_lea.vmem %s755_s0, %s566_s17 }
   0xf   : > { %v580_v0 = vld [vmem:[%s192_s16 + $0x18] sm:$0xff]  ;;  %v579_v1 = vld [vmem:[%s192_s16 + $0x10] sm:$0xff]  ;;  %v578_v2 = vld [vmem:[%s192_s16 + $0x8] sm:$0xff]  ;;  %s568_s21 = sshll.u32 %s763_s9, 7 }
  0x10   : > { %321 = vmatpush.bf16.msra.mxu0 %v580_v0  ;;  %581 = vmatpush.bf16.msra.mxu1 %v580_v0  ;;  %v577_v3 = vld [vmem:[%s192_s16] sm:$0xff]  ;;  %v571_v5 = vld [vmem:[%s186_s20 + $0x10] sm:$0xff]  ;;  %v570_v8 = vld [vmem:[%s186_s20 + $0x8] sm:$0xff]  ;;  %s728_s24 = scalar_lea.vmem %s757_s2, %s568_s21 }
  0x11   : > { %582 = vmatpush.bf16.msra.mxu2 %v580_v0  ;;  %583 = vmatpush.bf16.msra.mxu3 %v580_v0  ;;  %v569_v4 = vld [vmem:[%s186_s20] sm:$0xff]  ;;  %v575_v7 = vld [vmem:[%s186_s20 + $0x30] sm:$0xff]  ;;  %v572_v9 = vld [vmem:[%s186_s20 + $0x18] sm:$0xff] }
  0x12   : > { %v573_v6 = vld [vmem:[%s186_s20 + $0x20] sm:$0xff]  ;;  %v574_v10 = vld [vmem:[%s186_s20 + $0x28] sm:$0xff]  ;;  %v576_v11 = vld [vmem:[%s186_s20 + $0x38] sm:$0xff] }
  0x14   : > { %322 = vmatpush.bf16.msra.mxu0 %v579_v1  ;;  %584 = vmatpush.bf16.msra.mxu1 %v579_v1 }
  0x15   : > { %585 = vmatpush.bf16.msra.mxu2 %v579_v1  ;;  %586 = vmatpush.bf16.msra.mxu3 %v579_v1 }
  0x18   : > { %323 = vmatpush.bf16.msra.mxu0 %v578_v2  ;;  %587 = vmatpush.bf16.msra.mxu1 %v578_v2 }
  0x19   : > { %588 = vmatpush.bf16.msra.mxu2 %v578_v2  ;;  %589 = vmatpush.bf16.msra.mxu3 %v578_v2 }
  0x1c   : > { %324 = vmatpush.bf16.msra.mxu0 %v577_v3  ;;  %590 = vmatpush.bf16.msra.mxu1 %v577_v3 }
  0x1d   : > { %591 = vmatpush.bf16.msra.mxu2 %v577_v3  ;;  %592 = vmatpush.bf16.msra.mxu3 %v577_v3 }
  0x1f   : > { %556 = vmatmul.msk.bf16.vlgmr.msra.gmra.mxu0 %vm292_vm0, %v569_v4  ;;  %558 = vmatmul.msk.bf16.vlgmr.msra.gmra.mxu1 %vm292_vm0, %v571_v5 }
  0x20   : > { %560 = vmatmul.msk.bf16.vlgmr.msra.gmra.mxu2 %vm292_vm0, %v573_v6  ;;  %562 = vmatmul.msk.bf16.vlgmr.msra.gmra.mxu3 %vm292_vm0, %v575_v7 }
  0x2f   : > { %557 = vmatmul.msk.bf16.gmra.mxu0 %vm292_vm0, %v570_v8  ;;  %559 = vmatmul.msk.bf16.gmra.mxu1 %vm292_vm0, %v572_v9 }
  0x30   : > { %561 = vmatmul.msk.bf16.gmra.mxu2 %vm292_vm0, %v574_v10  ;;  %563 = vmatmul.msk.bf16.gmra.mxu3 %vm292_vm0, %v576_v11 }
  0x9c   : > { %v326_v12 = vpop.f32.mrf.mxu0  ;;  %v336_v13 = vpop.f32.mrf.mxu1 }
  0x9d   : > { %617 = vtanh.f32 %v326_v12 }
  0x9e   : > { %619 = vtanh.f32 %v336_v13 }
  0xa3   : > { %v618_v14 = vpop.eup %617  ;;  %v346_v15 = vpop.f32.mrf.mxu2 }
  0xa4   : > { %v356_v16 = vpop.f32.mrf.mxu3  ;;  %v620_v17 = vpop.eup %619  ;;  %382 = vst [vmem:[%s728_s24] sm:$0xff] %v618_v14  ;;  %621 = vtanh.f32 %v346_v15 }
  0xa5   : > { %v328_v18 = vpop.f32.mrf.mxu0  ;;  %v338_v19 = vpop.f32.mrf.mxu1  ;;  %386 = vst [vmem:[%s728_s24 + $0x20] sm:$0xff] %v620_v17  ;;  %623 = vtanh.f32 %v356_v16 }
  0xa6   : > { %625 = vtanh.f32 %v328_v18 }
  0xa7   : > { %627 = vtanh.f32 %v338_v19 }
  0xaa   : > { %v622_v20 = vpop.eup %621 }
  0xab   : > { %v624_v21 = vpop.eup %623  ;;  %390 = vst [vmem:[%s728_s24 + $0x40] sm:$0xff] %v622_v20  ;;  %v348_v22 = vpop.f32.mrf.mxu2 }
  0xac   : > { %v358_v23 = vpop.f32.mrf.mxu3  ;;  %v626_v24 = vpop.eup %625  ;;  %394 = vst [vmem:[%s728_s24 + $0x60] sm:$0xff] %v624_v21  ;;  %629 = vtanh.f32 %v348_v22 }
  0xad   : > { %v331_v25 = vpop.f32.mrf.mxu0  ;;  %v341_v26 = vpop.f32.mrf.mxu1  ;;  %383 = vst [vmem:[%s728_s24 + $0x8] sm:$0xff] %v626_v24  ;;  %631 = vtanh.f32 %v358_v23 }
  0xae   : > { %v628_v27 = vpop.eup %627  ;;  %633 = vtanh.f32 %v331_v25 }
  0xaf   : > { %387 = vst [vmem:[%s728_s24 + $0x28] sm:$0xff] %v628_v27  ;;  %635 = vtanh.f32 %v341_v26 }
  0xb2   : > { %v630_v28 = vpop.eup %629 }
  0xb3   : > { %v632_v29 = vpop.eup %631  ;;  %391 = vst [vmem:[%s728_s24 + $0x48] sm:$0xff] %v630_v28  ;;  %v351_v30 = vpop.f32.mrf.mxu2 }
  0xb4   : > { %v361_v31 = vpop.f32.mrf.mxu3  ;;  %v634_v32 = vpop.eup %633  ;;  %395 = vst [vmem:[%s728_s24 + $0x68] sm:$0xff] %v632_v29  ;;  %637 = vtanh.f32 %v351_v30 }
  0xb5   : > { %v333_v33 = vpop.f32.mrf.mxu0  ;;  %v343_v34 = vpop.f32.mrf.mxu1  ;;  %384 = vst [vmem:[%s728_s24 + $0x10] sm:$0xff] %v634_v32  ;;  %639 = vtanh.f32 %v361_v31 }
  0xb6   : > { %v636_v35 = vpop.eup %635  ;;  %641 = vtanh.f32 %v333_v33 }
  0xb7   : > { %388 = vst [vmem:[%s728_s24 + $0x30] sm:$0xff] %v636_v35  ;;  %643 = vtanh.f32 %v343_v34 }
  0xba   : > { %v638_v36 = vpop.eup %637 }
  0xbb   : > { %v640_v37 = vpop.eup %639  ;;  %392 = vst [vmem:[%s728_s24 + $0x50] sm:$0xff] %v638_v36  ;;  %v353_v38 = vpop.f32.mrf.mxu2 }
  0xbc   : > { %v363_v39 = vpop.f32.mrf.mxu3  ;;  %v642_v40 = vpop.eup %641  ;;  %396 = vst [vmem:[%s728_s24 + $0x70] sm:$0xff] %v640_v37  ;;  %645 = vtanh.f32 %v353_v38 }
  0xbd   : > { %v644_v41 = vpop.eup %643  ;;  %385 = vst [vmem:[%s728_s24 + $0x18] sm:$0xff] %v642_v40  ;;  %647 = vtanh.f32 %v363_v39 }
  0xbe   : > { %389 = vst [vmem:[%s728_s24 + $0x38] sm:$0xff] %v644_v41 }
  0xc2   : > { %v646_v42 = vpop.eup %645 }
  0xc3   : > { %v648_v43 = vpop.eup %647  ;;  %393 = vst [vmem:[%s728_s24 + $0x58] sm:$0xff] %v646_v42 }
  0xc4   : > { %397 = vst [vmem:[%s728_s24 + $0x78] sm:$0xff] %v648_v43 }
  0xc5 PF: > { %s12_s11 = sadd.s32 1, %s671_s11   ;;  %s758_s9 = smov %s667_s10 }
  0xc6   : > { %p9_p5 = scmp.ge.s32.totalorder %s12_s11, 6   ;;  %s759_s10 = smov %s761_s12 }
  0xc8   :  { %11 = sbr.rel (!%p9_p5) target bundleno = 2 (0x2), region = 61 }

</bundles_post_ra>
